<compile_context>
chip_gen: v7x
topology: tpu7x:2x2x1
jax: 0.10.0
libtpu: 0.0.40
codegen_flags: <defaults>
</compile_context>

<pallas_src>
import jax
import jax.numpy as jnp
from jax.experimental import pallas as pl
from jax.experimental.pallas import tpu as pltpu


_VMEM_LIMIT = 48 * 1024 * 1024          # safe on v5e/v6e (128 MiB) and v7x (64 MiB)
_MAIN_TILE_BYTES = 6 << 20              # per (C, tile) f32 input buffer, main pass
_STATS_TILE_BYTES = 4 << 20             # stats pass has more in-kernel temporaries


def _pick_spatial_tile(hw, c, n, target_bytes):
    """Lane-dense spatial tile (multiple of 128) sized toward target_bytes of f32
    per (c, tile) buffer.  The grid uses pl.cdiv, so the tile does NOT need to
    divide hw (last block may be partial).  hw < 128 -> single full-extent block.
    """
    if hw < 128:
        return hw
    target = max(128, (target_bytes // (max(c, 1) * 4)) // 128 * 128)
    t = min(target, (hw // 128) * 128)
    if n == 1 and hw > 128:
        # Keep >= 2 spatial blocks so both v7x TensorCores get work and the
        # DMA pipeline has something to overlap with.
        t = min(t, max(128, (hw // 2) // 128 * 128))
    return t


# ----------------------------------------------------------------------------
# Pass 1: BN batch statistics (one read of x)
# ----------------------------------------------------------------------------
def _make_bn_stats_kernel(hw, thw, need_mask):
    def kernel(x_ref, p_ref, s1_ref, s2_ref):
        # x_ref : (C, thw) spatial tile of one sample
        # p_ref : (C, 1)   per-channel pivot (stability shift)
        # s1/s2 : (C, 1)   partial shifted sums for this (sample, block)
        j = pl.program_id(1)
        d = x_ref[...].astype(jnp.float32) - p_ref[...]
        if need_mask:
            # Last spatial block is partial: zero the padded lanes so garbage
            # in the pad region never reaches the reduction.
            lane = jax.lax.broadcasted_iota(jnp.int32, d.shape, 1)
            d = jnp.where(lane < (hw - j * thw), d, 0.0)
        s1_ref[...] = jnp.sum(d, axis=1, keepdims=True)
        s2_ref[...] = jnp.sum(d * d, axis=1, keepdims=True)
    return kernel


def _bn_batch_stats(x3, eps_dtype=jnp.float32):
    """Single-pass (3x|x| total for the whole forward) BN batch stats."""
    N, C, HW = x3.shape
    # Cheap per-channel pivot (~first vreg row of sample 0) to kill cancellation.
    pivot = jnp.mean(x3[0, :, : min(128, HW)].astype(jnp.float32),
                     axis=1, keepdims=True)                       # (C, 1)

    thw = _pick_spatial_tile(HW, C, N, _STATS_TILE_BYTES)
    nblk = pl.cdiv(HW, thw)
    need_mask = (HW % thw) != 0

    s1p, s2p = pl.pallas_call(
        _make_bn_stats_kernel(HW, thw, need_mask),
        out_shape=(jax.ShapeDtypeStruct((N, nblk, C, 1), jnp.float32),
                   jax.ShapeDtypeStruct((N, nblk, C, 1), jnp.float32)),
        grid_spec=pltpu.PrefetchScalarGridSpec(
            num_scalar_prefetch=0,
            grid=(N, nblk),
            in_specs=[
                pl.BlockSpec((None, C, thw), lambda n, j: (n, 0, j)),   # x tile
                pl.BlockSpec((C, 1), lambda n, j: (0, 0)),              # pivot
            ],
            out_specs=[
                pl.BlockSpec((None, None, C, 1), lambda n, j: (n, j, 0, 0)),
                pl.BlockSpec((None, None, C, 1), lambda n, j: (n, j, 0, 0)),
            ],
        ),
        compiler_params=pltpu.CompilerParams(
            dimension_semantics=("parallel", "parallel"),
            vmem_limit_bytes=_VMEM_LIMIT,
        ),
    )(x3, pivot)

    cnt = jnp.asarray(N * HW, jnp.float32)
    s1 = jnp.sum(s1p, axis=(0, 1))[:, 0]          # (C,) tiny JAX reduction
    s2 = jnp.sum(s2p, axis=(0, 1))[:, 0]
    dm = s1 / cnt
    mean = pivot[:, 0] + dm
    var = jnp.maximum(s2 / cnt - dm * dm, 0.0)     # biased var, pivot-shifted
    return mean.astype(eps_dtype), var.astype(eps_dtype)


# ----------------------------------------------------------------------------
# Pass 2: fused (BN + 1x1 conv + residual) channel mix
# ----------------------------------------------------------------------------
def _series_adapter_kernel(x_ref, w_ref, b_ref, o_ref):
    # x_ref: (C, T)  spatial tile of one sample (channels on sublanes)
    # w_ref: (C, C)  fused matrix   W * diag(scale) + I
    # b_ref: (C, 1)  fused bias     W @ shift
    # o_ref: (C, T)  output tile
    x = x_ref[...].astype(jnp.float32)
    w = w_ref[...].astype(jnp.float32)
    b = b_ref[...].astype(jnp.float32)
    c = x.shape[0]

    if c > 8:
        # Larger channel counts: ride the MXU (vector-extended slot).
        acc = jnp.dot(w, x, preferred_element_type=jnp.float32) + b
    else:
        # Tiny channel count: unrolled broadcast multiply-add on the VPU.
        # (Per review: on v7x this may become XLU/VALU-bound if the broadcasts
        #  do not fold into replicated vreg layouts; keep the verified path and
        #  only switch to the MXU path after a bundle dump confirms it.)
        acc = w[:, 0:1] * x[0:1, :] + b
        for ci in range(1, c):
            acc = acc + w[:, ci:ci + 1] * x[ci:ci + 1, :]

    o_ref[...] = acc.astype(o_ref.dtype)


def conv1x1_series_forward(x_nchw, weight, gamma, beta, eps=1e-5,
                           running_mean=None, running_var=None):
    """conv1x1 adapter forward, task_mode='series', dims=2.

    x_nchw : (N, C, H, W) float32 (bf16 also accepted; compute stays f32)
    weight : (C, C) conv1x1 weight (C_out, C_in), bias=False
    gamma, beta : (C,) BatchNorm affine params
    running_mean/var : pass both to get eval-mode BN; default is training-mode
                       BN with batch statistics (matches a fresh module).
    """
    N, C, H, W = x_nchw.shape
    HW = H * W
    x3 = x_nchw.reshape(N, C, HW)      # free reshape; layout stays NCHW

    # --- BN statistics ---
    if running_mean is not None and running_var is not None:
        mean = running_mean.astype(jnp.float32)
        var = running_var.astype(jnp.float32)
    else:
        mean, var = _bn_batch_stats(x3)

    # --- fold BN + 1x1 conv + residual into one matrix + bias (tiny, in JAX) ---
    w32 = weight.astype(jnp.float32)
    scale = gamma.astype(jnp.float32) / jnp.sqrt(var + eps)          # (C,)
    shift = beta.astype(jnp.float32) - mean * scale                  # (C,)
    w_total = w32 * scale[None, :] + jnp.eye(C, dtype=jnp.float32)   # (C, C)
    bias = (w32 @ shift).reshape(C, 1)                               # (C, 1)

    # --- fused per-pixel channel mix ---
    thw = _pick_spatial_tile(HW, C, N, _MAIN_TILE_BYTES)
    grid = (N, pl.cdiv(HW, thw))

    w_kwargs = {}
    if C >= 512:
        # Constant index_map across the grid: single-buffer the fused weight so
        # double-buffering (2*C^2*4 B) never eats into the spatial-tile VMEM.
        w_kwargs = dict(pipeline_mode=pl.Buffered(buffer_count=1))

    out = pl.pallas_call(
        _series_adapter_kernel,
        out_shape=jax.ShapeDtypeStruct((N, C, HW), x3.dtype),
        grid_spec=pltpu.PrefetchScalarGridSpec(
            num_scalar_prefetch=0,
            grid=grid,
            in_specs=[
                pl.BlockSpec((None, C, thw), lambda n, j: (n, 0, j)),      # x
                pl.BlockSpec((C, C), lambda n, j: (0, 0), **w_kwargs),     # fused W
                pl.BlockSpec((C, 1), lambda n, j: (0, 0)),                 # fused bias
            ],
            out_specs=pl.BlockSpec((None, C, thw), lambda n, j: (n, 0, j)),
        ),
        compiler_params=pltpu.CompilerParams(
            dimension_semantics=("parallel", "parallel"),
            vmem_limit_bytes=_VMEM_LIMIT,
        ),
    )(x3, w_total, bias)

    return out.reshape(N, C, H, W)


def _reference(x_nchw, weight, gamma, beta, eps=1e-5):
    """Pure-JAX reference mirroring the PyTorch series adapter in training mode."""
    mean = jnp.mean(x_nchw, axis=(0, 2, 3), keepdims=True)
    var = jnp.mean((x_nchw - mean) ** 2, axis=(0, 2, 3), keepdims=True)
    xn = (x_nchw - mean) / jnp.sqrt(var + eps)
    xn = xn * gamma[None, :, None, None] + beta[None, :, None, None]
    y = jnp.einsum('nchw,oc->nohw', xn, weight)
    return y + x_nchw


if __name__ == "__main__":
    key = jax.random.PRNGKey(0)

    # Case 1: spatial a multiple of 128 (no partial blocks).
    # Case 2: odd spatial size + N=1 (exercises partial/masked blocks and the
    #         N==1 two-block guard).
    for (N, C, H, W) in [(2, 4, 16, 16), (1, 4, 20, 13)]:
        key, k_x, k_w = jax.random.split(key, 3)
        x = jax.random.normal(k_x, (N, C, H, W), dtype=jnp.float32)

        # Deterministic params (Conv2d(C, C, 1, bias=False); BatchNorm2d defaults).
        bound = 1.0 / jnp.sqrt(jnp.float32(C))
        weight = jax.random.uniform(k_w, (C, C), jnp.float32, -bound, bound)
        gamma = jnp.ones((C,), jnp.float32)
        beta = jnp.zeros((C,), jnp.float32)

        out = conv1x1_series_forward(x, weight, gamma, beta)
        out = jax.block_until_ready(out)

        ref = _reference(x, weight, gamma, beta)
        assert out.shape == (N, C, H, W)
        assert jnp.allclose(out, ref, atol=1e-4, rtol=1e-4), (N, C, H, W)

    print("KERNEL_OK")
</pallas_src>

<mosaic_0001>
module attributes {stable_mosaic.version = 11 : i64} {
  func.func @kernel(%arg0: i32, %arg1: i32, %arg2: memref<1x4x256xf32, #tpu.memory_space<vmem>>, %arg3: memref<4x1xf32, #tpu.memory_space<vmem>>, %arg4: memref<1x1x4x1xf32, #tpu.memory_space<vmem>>, %arg5: memref<1x1x4x1xf32, #tpu.memory_space<vmem>>) attributes {dimension_semantics = [#tpu.dimension_semantics<parallel>, #tpu.dimension_semantics<parallel>], iteration_bounds = array<i64: 2, 1>, scalar_prefetch = 0 : i64, scratch_operands = 0 : i64, tpu.core_type = #tpu.core_type<tc>, window_params = [{transform_indices = @transform_0, window_bounds = array<i64: 1, 4, 256>}, {pipeline_mode = #tpu.pipeline_mode<synchronous>, transform_indices = @transform_1, window_bounds = array<i64: 4, 1>}, {transform_indices = @transform_2, window_bounds = array<i64: 1, 1, 4, 1>}, {transform_indices = @transform_3, window_bounds = array<i64: 1, 1, 4, 1>}]} {
    %c0 = arith.constant 0 : index
    %c0_0 = arith.constant 0 : index
    %c0_1 = arith.constant 0 : index
    %0 = vector.load %arg2[%c0, %c0_0, %c0_1] : memref<1x4x256xf32, #tpu.memory_space<vmem>>, vector<1x4x256xf32>
    %1 = vector.shape_cast %0 : vector<1x4x256xf32> to vector<4x256xf32>
    %c0_2 = arith.constant 0 : index
    %c0_3 = arith.constant 0 : index
    %2 = vector.load %arg3[%c0_2, %c0_3] : memref<4x1xf32, #tpu.memory_space<vmem>>, vector<4x1xf32>
    %3 = vector.broadcast %2 : vector<4x1xf32> to vector<4x256xf32>
    %4 = arith.subf %1, %3 : vector<4x256xf32>
    %cst = arith.constant dense<0.000000e+00> : vector<4xf32>
    %5 = vector.multi_reduction <add>, %4, %cst [1] : vector<4x256xf32> to vector<4xf32>
    %6 = vector.shape_cast %5 : vector<4xf32> to vector<4x1xf32>
    %c0_4 = arith.constant 0 : index
    %c0_5 = arith.constant 0 : index
    %c0_6 = arith.constant 0 : index
    %c0_7 = arith.constant 0 : index
    %7 = vector.load %arg4[%c0_4, %c0_5, %c0_6, %c0_7] : memref<1x1x4x1xf32, #tpu.memory_space<vmem>>, vector<1x1x4x1xf32>
    %8 = vector.shape_cast %7 : vector<1x1x4x1xf32> to vector<4x1xf32>
    %9 = vector.shape_cast %6 : vector<4x1xf32> to vector<1x1x4x1xf32>
    tpu.vector_store %arg4[%c0_4, %c0_5, %c0_6, %c0_7], %9 {strides = array<i32>} : memref<1x1x4x1xf32, #tpu.memory_space<vmem>>, vector<1x1x4x1xf32>,
    %10 = arith.mulf %4, %4 : vector<4x256xf32>
    %cst_8 = arith.constant dense<0.000000e+00> : vector<4xf32>
    %11 = vector.multi_reduction <add>, %10, %cst_8 [1] : vector<4x256xf32> to vector<4xf32>
    %12 = vector.shape_cast %11 : vector<4xf32> to vector<4x1xf32>
    %c0_9 = arith.constant 0 : index
    %c0_10 = arith.constant 0 : index
    %c0_11 = arith.constant 0 : index
    %c0_12 = arith.constant 0 : index
    %13 = vector.load %arg5[%c0_9, %c0_10, %c0_11, %c0_12] : memref<1x1x4x1xf32, #tpu.memory_space<vmem>>, vector<1x1x4x1xf32>
    %14 = vector.shape_cast %13 : vector<1x1x4x1xf32> to vector<4x1xf32>
    %15 = vector.shape_cast %12 : vector<4x1xf32> to vector<1x1x4x1xf32>
    tpu.vector_store %arg5[%c0_9, %c0_10, %c0_11, %c0_12], %15 {strides = array<i32>} : memref<1x1x4x1xf32, #tpu.memory_space<vmem>>, vector<1x1x4x1xf32>,
    return
  }
  func.func @transform_0(%arg0: i32, %arg1: i32) -> (i32, i32, i32) {
    %c0_i32 = arith.constant 0 : i32
    %c0_i32_0 = arith.constant 0 : i32
    return %arg0, %c0_i32, %arg1 : i32, i32, i32
  }
  func.func @transform_1(%arg0: i32, %arg1: i32) -> (i32, i32) {
    %c0_i32 = arith.constant 0 : i32
    %c0_i32_0 = arith.constant 0 : i32
    %c0_i32_1 = arith.constant 0 : i32
    return %c0_i32, %c0_i32_0 : i32, i32
  }
  func.func @transform_2(%arg0: i32, %arg1: i32) -> (i32, i32, i32, i32) {
    %c0_i32 = arith.constant 0 : i32
    %c0_i32_0 = arith.constant 0 : i32
    %c0_i32_1 = arith.constant 0 : i32
    return %arg0, %arg1, %c0_i32, %c0_i32_0 : i32, i32, i32, i32
  }
  func.func @transform_3(%arg0: i32, %arg1: i32) -> (i32, i32, i32, i32) {
    %c0_i32 = arith.constant 0 : i32
    %c0_i32_0 = arith.constant 0 : i32
    %c0_i32_1 = arith.constant 0 : i32
    return %arg0, %arg1, %c0_i32, %c0_i32_0 : i32, i32, i32, i32
  }
}

</mosaic_0001>

<bundles_post_ra>
// kernel: tpu_custom_call.1
= control target key start
LH: loop header
LB: loop body
LE: loop exit
PB: predicated region body
PF: predicated region fallthrough
CT: control target
= control target key end

     0   :  { %9 = vsyncpa [#allocation3], 0  ;;  %s702_s0 = inlined_call_operand.hbm [shape: f32[2,4,256], index: 0, kind: input, shape index: {}]   ;;  %s703_s1 = inlined_call_operand.vmem [shape: f32[4,1], index: 1, kind: input, shape index: {}]   ;;  %s704_s2 = inlined_call_operand.vmem [shape: f32[2,1,4,1], index: 2, kind: output, shape index: {0}]   ;;  %s705_s3 = inlined_call_operand.vmem [shape: f32[2,1,4,1], index: 3, kind: output, shape index: {1}]  }
   0x1   :  { %11 = vsyncpa [#allocation3 + $0x1], 0  ;;  %s571_s12 = smov 0   ;;  %s573_s13 = smov 0  }
   0x2   :  { %s575_s14 = smov 0   ;;  %s577_s15 = smov 0  }
   0x3   :  { %s579_s16 = smov 0   ;;  %s581_s17 = smov 0  }
   0x4 LB: > { %s394_s18 = sadd.s32 4294967295, %s546_s17   ;;  %s29_s19 = sadd.s32 1, %s542_s16  ;;  %s546_s17 = sphi %s581_s17, %s17_s17   ;;  %s542_s16 = sphi %s579_s16, %s715_s16   ;;  %s538_s15 = sphi %s577_s15, %s714_s15   ;;  %s534_s14 = sphi %s575_s14, %s713_s14   ;;  %s530_s13 = sphi %s573_s13, %s712_s13   ;;  %s526_s12 = sphi %s571_s12, %s711_s12  }
   0x5   : > { %p31_p0 = scmp.ge.s32.totalorder %s29_s19, 2  ;;  %s38_s20 = sadd.s32 1, %s534_s14 }
   0x6   : > { %p45_p1 = scmp.ne.s32.totalorder %s534_s14, %s530_s13  ;;  %p46_p2 = scmp.eq.s32.totalorder %s546_s17, 0 }
   0x7   : > { %s717_s19 = smov (%p31_p0, %s29_s19), 0  ;;  %p51_p4 = scmp.ne.s32.totalorder %s530_s13, %s526_s12 }
   0x8   : > { %p607_p3 = por %p46_p2, %p45_p1  ;;  %s33_s22 = ssub.s32 %s542_s16, %s717_s19 }
   0x9   : > { %p52_p5 = scmp.eq.s32.totalorder %s394_s18, 0  ;;  %p36_p6 = scmp.eq.s32.totalorder %s33_s22, 0 }
   0xa   : > { %p414_p8 = scmp.lt.s32.totalorder %s546_s17, 2  ;;  %s155_s25 = sand.u32 1, %s534_s14  }
   0xb   : > { %p614_p7 = por %p52_p5, %p51_p4  ;;  %s407_s26 = sshll.u32 %s542_s16, 7 }
   0xc   : > { %s620_s24 = scalar_select %p36_p6, %s534_s14, %s38_s20  }
   0xd   : > { %s398_s27 = sshll.u32 %s155_s25, 3  ;;  %s627_s30 = scalar_lea.hbm %s702_s0, %s407_s26 }
   0xe   : > { %s159_s4 = scalar_lea.vmem [#allocation2], %s398_s27  ;;  %p631_p9 = pnand %p414_p8, %p607_p3 }
   0xf   : > { %s169_s5 = sshll.u32 %s159_s4, 4  ;;  %s156_s7 = scalar_lea.sflag [#allocation3], %s155_s25  ;;  %s635_s5 = int_to_ptr.vmem [resolvable:$true] %s169_s5 }
  0x10   : > { %s466_s8 = scalar_lea.hbm %s627_s30, 128  ;;  %p468_p13 = pneg %p631_p9 }
  0x11   : > { %p467_p12 = scmp.ne.s32.totalorder %s627_s30, %s466_s8  ;;  %s471_s11 = scalar_lea.hbm %s702_s0, 256 }
  0x12   : > { %p472_p2 = scmp.lt.u32.totalorder %s627_s30, %s702_s0  ;;  %p473_p3 = scmp.lt.u32.totalorder %s471_s11, %s466_s8 }
  0x13   : > { %p469_p0 = pnand %p468_p13, %p467_p12  ;;  %p475_p5 = scmp.lt.u32.totalorder %s466_s8, %s627_s30 }
  0x14   : > { %p474_p4 = por %p473_p3, %p472_p2 }
  0x15   : > { %p470_p1 = pneg %p469_p0 }
  0x16   : > { %p476_p6 = por %p475_p5, %p474_p4 }
  0x18   : > { %p477_p8 = pnand %p476_p6, %p470_p1 }
  0x1a   : > { %480 = shalt.err (!%p477_p8)
}
  0x1b   : > { %s481_s20 = scalar_lea.vmem %s635_s5, 128  ;;  %s548_s21 = smov [#allocation2]  }
  0x1c   : > { %p482_p12 = scmp.ne.s32.totalorder %s635_s5, %s481_s20  ;;  %s486_s22 = sshll.u32 %s548_s21, 4  ;;  %s487_s22 = int_to_ptr.vmem [resolvable:$false] %s486_s22 }
  0x1d   : > { %s488_s25 = scalar_lea.vmem %s487_s22, 256  ;;  %p489_p11 = scmp.lt.s32.totalorder %s635_s5, %s487_s22 }
  0x1e   : > { %p484_p0 = pnand %p482_p12, %p468_p13  ;;  %p490_p2 = scmp.lt.s32.totalorder %s488_s25, %s481_s20 }
  0x20   : > { %p485_p10 = pneg %p484_p0  ;;  %p491_p3 = por %p490_p2, %p489_p11 }
  0x22   : > { %p492_p4 = pnand %p491_p3, %p485_p10 }
  0x24   : > { %495 = shalt.err (!%p492_p4)
}
  0x25   : > { %413 = dma.hbm_to_vmem [thread:$0]  (!%p631_p9), %s627_s30, 128, %s635_s5, %s156_s7  }
  0x26   : > { %p709_p1 = scmp.lt.s32.totalorder %s546_s17, 3  ;;  %p710_p5 = scmp.ge.s32.totalorder %s546_s17, 1 }
  0x28   : > { %p175_p13 = pnand %p710_p5, %p709_p1 }
  0x29   : > { %s180_s26 = sand.u32 (!%p175_p13), 1, %s530_s13  }
  0x2a   : > { %178 = sbr.rel (%p175_p13) target bundleno = 334 (0x14e), region = 28  ;;  %s402_s27 = sshll.u32 (!%p175_p13), %s180_s26, 3 }
  0x2b   : > { %s181_s28 = scalar_lea.sflag (!%p175_p13), [#allocation3], %s180_s26  ;;  %s184_s29 = scalar_lea.vmem (!%p175_p13), [#allocation2], %s402_s27 }
  0x31   : > { %521 = dma.done.wait (%p614_p7), %s181_s28, 128  }
  0x32   : > { %523 = vsyncadd (%p614_p7), %s181_s28, 4294967168  ;;  %v549_v0 = vmov 0   ;;  %v232_v1 = vld [vmem:[%s703_s1] sm:$0xf]  ;;  %v550_v2 = vmov 839922192   ;;  %v240_v4 = vlaneseq }
  0x33   : > { %465 = vset.pattern.permute.xlu0 %v549_v0  ;;  %v238_v3 = vunpack.c.l.s4 %v550_v2  ;;  %v231_v9 = vld [vmem:[%s184_s29] sm:$0xff]  ;;  %vm249_vm0 = vcmask 1043456   ;;  %p217_p7 = scmp.lt.s32.totalorder %s538_s15, 1  ;;  %vm255_vm1 = vcmask 3072  }
  0x34   : > { %235 = vperm.xlu0 %465, %v232_v1   ;;  %v241_v6 = vshrl.u32 %v240_v4, 7 }
  0x35   : > { %v239_v5 = vunpack.c.0.s8 %v238_v3  ;;  %s719_s15 = smov (!%p217_p7, %s538_s15), 1 }
  0x36   : > { %s403_s23 = sshll.u32 %s719_s15, 2 }
  0x37   : > { %v242_v7 = vsub.s32 %v239_v5, %v241_v6  ;;  %s223_s7 = scalar_lea.vmem %s704_s2, %s403_s23  ;;  %s230_s10 = scalar_lea.vmem %s705_s3, %s403_s23 }
  0xb3   : > { %v236_v8 = vpop.permute.xlu0 %235 }
  0xb4   : > { %v243_v10 = vrot.slane %v236_v8, %v242_v7 }
  0xb6   : > { %v245_v11 = vsub.f32 %v231_v9, %v243_v10 }
  0xb8   : > { %v247_v12 = vcombine.high %v245_v11, %v245_v11  ;;  %v257_v13 = vmul.f32 %v245_v11, %v245_v11  ;;  %v250_v14 = vsel %vm249_vm0, %v245_v11, 0.0 }
  0xba   : > { %v251_v15 = vsel %vm249_vm0, %v247_v12, 0.0  ;;  %v259_v16 = vcombine.high %v257_v13, %v257_v13  ;;  %v261_v18 = vsel %vm249_vm0, %v257_v13, 0.0 }
  0xbb   : > { %v252_v17 = vadd.f32 %v251_v15, %v250_v14 }
  0xbc   : > { %v262_v19 = vsel %vm249_vm0, %v259_v16, 0.0 }
  0xbd   : > { %253 = vadd.xlane.f32.xlu0 %v252_v17  ;;  %v263_v20 = vadd.f32 %v262_v19, %v261_v18 }
  0xbf   : > { %264 = vadd.xlane.f32.xlu1 %v263_v20 }
 0x14a   : > { %v254_v21 = vpop.xlane.xlu0 %253 }
 0x14b   : > { %256 = vst.msk [vmem:[%s223_s7] sm:$0xf] %vm255_vm1, %v254_v21 }
 0x14c   : > { %v265_v22 = vpop.xlane.xlu1 %264 }
 0x14d   : > { %266 = vst.msk [vmem:[%s230_s10] sm:$0xf] %vm255_vm1, %v265_v22 }
 0x14e PF: > { %s17_s17 = sadd.s32 1, %s546_s17   ;;  %s711_s12 = smov %s530_s13 }
 0x14f   : > { %p14_p9 = scmp.ge.s32.totalorder %s17_s17, 4   ;;  %s712_s13 = smov %s534_s14 }
 0x150   : > { %s713_s14 = smov %s620_s24  ;;  %s714_s15 = smov %s542_s16 }
 0x151   : > { %s715_s16 = smov %s717_s19  ;;  %16 = sbr.rel (!%p14_p9) target bundleno = 4 (0x4), region = 80 }
 0x158   :  { %312 = vsyncpa [#allocation3], 1 }
 0x159   :  { %314 = vsyncpa [#allocation3 + $0x1], 1 }

</bundles_post_ra>
